<compile_context>
chip_gen: v6e
topology: v6e:2x2x1
jax: 0.10.0
libtpu: 0.0.40
codegen_flags: <defaults>
</compile_context>

<pallas_src>
import math

import jax
import jax.numpy as jnp
from jax.experimental import pallas as pl
from jax.experimental.pallas import tpu as pltpu


def _round_up(x, m):
    return ((x + m - 1) // m) * m


def _gat_kernel(q_ref, k_ref, v_ref, adj_ref, s_ref,
                wk_sel_ref, expand_ref, w_pack_ref, out_ref):
    """One batch tile.
       k_ref/v_ref : (tb, N*H)  flattened node x feature axis (lane-dense)
       out_ref     : (tb, P)    packed [attn(N) | attn_sum(H) | 0], P % 128 == 0
    """
    h = q_ref.shape[-1]
    n = adj_ref.shape[-1]
    nh = k_ref.shape[-1]

    k = k_ref[...]                                   # (tb, NH) f32 or bf16
    v = v_ref[...]                                   # (tb, NH) f32 or bf16
    adj = adj_ref[...]                               # (tb, N)  f32
    s = s_ref[...]                                   # (tb, N)  f32

    # alpha[b, n] = K[b, n, :] . w_k via one MXU contraction over N*H.
    # (The wq.Q_b + bias part of the original Linear is constant per row; the
    #  softmax over n is exactly invariant to it, so it is dropped here.)
    alpha = jnp.dot(k, wk_sel_ref[...], preferred_element_type=jnp.float32)   # (tb, N)
    alpha = alpha - (1.0 - adj) * 1e30               # mask_logic

    # numerically stable softmax over the node axis
    m = jnp.max(alpha, axis=-1, keepdims=True)
    e = jnp.exp(alpha - m)
    attn = e / jnp.sum(e, axis=-1, keepdims=True)    # (tb, N) f32

    # Packed projection into the lane-dense output slab:
    #   out[:, 0:N]   = attn                                   (0/1 placement rows)
    #   out[:, N:N+H] = ((attn*s) bcast .* V) @ Wr0^T
    #                 + ((attn*(1-s)) bcast .* V) @ Wr1^T
    #                 + Q @ Wri^T
    # "bcast" = expand each per-node weight across that node's H lanes via the
    # 0/1 (N, N*H) expand matrix, so everything stays MXU + elementwise VPU.
    w = w_pack_ref
    expand = expand_ref[...]                         # (N, NH) 0/1 f32

    out = jnp.dot(attn, w[0:n, :], preferred_element_type=jnp.float32)        # (tb, P)

    g0 = attn * s                                    # Wr0 branch (s_mask == 1)
    g0e = jnp.dot(g0, expand, preferred_element_type=jnp.float32)             # (tb, NH)
    out = out + jnp.dot(g0e * v, w[n:n + nh, :],
                        preferred_element_type=jnp.float32)

    g1e = jnp.dot(attn - g0, expand, preferred_element_type=jnp.float32)      # (tb, NH)
    out = out + jnp.dot(g1e * v, w[n + nh:n + 2 * nh, :],
                        preferred_element_type=jnp.float32)

    out = out + jnp.dot(q_ref[...].astype(jnp.float32), w[n + 2 * nh:, :],
                        preferred_element_type=jnp.float32)

    out_ref[...] = out.astype(out_ref.dtype)


def gat_forward(Q, K, V, adj, s_mask, params, *, batch_tile=None, kv_dtype=None):
    """Q: (B,H), K/V: (B,N,H), adj/s_mask: (B,N)
       -> (attn_weight (B,1,N), attn_sum (B,H)), matching GAT.forward."""
    B, N, H = K.shape
    assert Q.shape == (B, H)
    NH = N * H
    LANE = 128
    P = _round_up(N + H, LANE)                     # lane-dense packed output width
    f32 = jnp.float32

    # ---- fold module weights into kernel-friendly, VMEM-resident operands ----
    wk = params["w_att"][:, H:].reshape(H).astype(f32)       # K-half of attention Linear
    eye_n = jnp.eye(N, dtype=f32)
    expand = jnp.repeat(eye_n, H, axis=1)                    # (N, NH): node -> its H lanes
    wk_sel = expand.T * jnp.tile(wk, N)[:, None]             # (NH, N): per-node dot with wk

    def _place(w):       # put an (?, H) projection into output columns [N, N+H)
        return jnp.pad(w.astype(f32), ((0, 0), (N, P - N - H)))

    w_pack = jnp.concatenate([
        jnp.pad(eye_n, ((0, 0), (0, P - N))),                # attn -> columns [0, N)
        _place(jnp.tile(params["w0t"].astype(f32), (N, 1))),  # (NH, P) Wr0^T per node
        _place(jnp.tile(params["w1t"].astype(f32), (N, 1))),  # (NH, P) Wr1^T per node
        _place(params["writ"]),                               # (H, P)  Wri^T
    ], axis=0)                                               # (N + 2NH + H, P)

    # ---- inputs: flatten (N,H) so the minor dim is N*H (lane-dense when a
    #      multiple of 128); optionally ship K/V in bf16 to halve HBM traffic ----
    kv_dt = jnp.dtype(kv_dtype) if kv_dtype is not None else K.dtype
    k_flat = K.reshape(B, NH).astype(kv_dt)
    v_flat = V.reshape(B, NH).astype(kv_dt)
    wk_sel = wk_sel.astype(kv_dt)                  # MXU partner of k_flat (f32 accumulate)
    q_f = Q.astype(f32)
    adj_f = adj.astype(f32)
    s_f = s_mask.astype(f32)

    # ---- batch tile: as big as the most constrained generation allows
    #      (v7x: 64 MiB physical VMEM), double-buffered, and >=2 grid steps so
    #      both v7x TensorCores get a share of the "parallel" batch axis ----
    per_row_bytes = (2 * _round_up(NH, LANE) * jnp.dtype(kv_dt).itemsize   # K + V
                     + _round_up(H, LANE) * 4                             # Q
                     + 2 * _round_up(N, LANE) * 4                         # adj, s_mask
                     + P * 4)                                             # packed output
    if batch_tile is None:
        vmem_budget = 24 * 1024 * 1024             # conservative vs v7x 64 MiB VMEM
        tb = min(B, 1024, max(8, vmem_budget // (2 * per_row_bytes)))
        if B >= 128:                               # keep >= 2 steps for megacore
            tb = min(tb, _round_up(pl.cdiv(B, 2), 8))
    else:
        tb = min(B, batch_tile)
    tb = max(8, (tb // 8) * 8)

    num_tiles = pl.cdiv(B, tb)
    b_pad = num_tiles * tb
    if b_pad != B:                                 # pad batch so tiles divide evenly
        pad = ((0, b_pad - B), (0, 0))
        q_f = jnp.pad(q_f, pad)
        k_flat = jnp.pad(k_flat, pad)
        v_flat = jnp.pad(v_flat, pad)
        adj_f = jnp.pad(adj_f, pad)
        s_f = jnp.pad(s_f, pad)

    flops = 2 * b_pad * (NH * N + 2 * N * NH + 2 * NH * P + H * P + N * P) + 8 * b_pad * NH
    bytes_accessed = (2 * b_pad * NH * jnp.dtype(kv_dt).itemsize
                      + 4 * b_pad * (H + 2 * N + P)
                      + 4 * (wk_sel.size + expand.size + w_pack.size))

    packed = pl.pallas_call(
        _gat_kernel,
        out_shape=jax.ShapeDtypeStruct((b_pad, P), f32),
        grid_spec=pltpu.PrefetchScalarGridSpec(
            num_scalar_prefetch=0,
            grid=(num_tiles,),
            in_specs=[
                pl.BlockSpec((tb, H), lambda i: (i, 0)),              # Q
                pl.BlockSpec((tb, NH), lambda i: (i, 0)),             # K (flattened)
                pl.BlockSpec((tb, NH), lambda i: (i, 0)),             # V (flattened)
                pl.BlockSpec((tb, N), lambda i: (i, 0)),              # adj
                pl.BlockSpec((tb, N), lambda i: (i, 0)),              # s_mask
                pl.BlockSpec((NH, N), lambda i: (0, 0)),              # wk selector   (resident)
                pl.BlockSpec((N, NH), lambda i: (0, 0)),              # node expand   (resident)
                pl.BlockSpec((N + 2 * NH + H, P), lambda i: (0, 0)),  # packed proj   (resident)
            ],
            out_specs=pl.BlockSpec((tb, P), lambda i: (i, 0)),
        ),
        compiler_params=pltpu.CompilerParams(
            dimension_semantics=("parallel",),
            vmem_limit_bytes=64 * 1024 * 1024),
        cost_estimate=pl.CostEstimate(
            flops=flops, transcendentals=b_pad * N, bytes_accessed=bytes_accessed),
    )(q_f, k_flat, v_flat, adj_f, s_f, wk_sel, expand, w_pack)

    attn_w = packed[:B, :N].reshape(B, 1, N).astype(Q.dtype)
    attn_sum = packed[:B, N:N + H].astype(Q.dtype)
    return attn_w, attn_sum


def init_params(key, hidden_size, dtype=jnp.float32):
    """Mirrors the PyTorch module's Linear layers (weights stored transposed)."""
    H = hidden_size
    ks = jax.random.split(key, 5)

    def u(k, shape, fan_in):
        bound = 1.0 / math.sqrt(fan_in)
        return jax.random.uniform(k, shape, dtype=dtype, minval=-bound, maxval=bound)

    return {
        "w_att": u(ks[0], (1, 2 * H), 2 * H),   # nn.Linear(2H, 1).weight
        "b_att": u(ks[1], (1, 1), 2 * H),       # nn.Linear(2H, 1).bias
        "w0t":  u(ks[2], (H, H), H),            # Wr0.weight.T   (no bias)
        "w1t":  u(ks[3], (H, H), H),            # Wr1.weight.T   (no bias)
        "writ": u(ks[4], (H, H), H),            # Wri.weight.T   (no bias)
    }


def _reference_forward(Q, K, V, adj, s_mask, p):
    """Pure-JAX transcription of the PyTorch GAT.forward (includes wq + bias)."""
    B, N, H = K.shape
    Qe = jnp.broadcast_to(Q[:, None, :], (B, N, H))
    X = jnp.concatenate([Qe, K], axis=2)                           # (B, N, 2H)
    alpha = (X @ p["w_att"].T)[..., 0] + p["b_att"][0, 0]          # (B, N)
    alpha = alpha[:, None, :]                                      # (B, 1, N)
    alpha = alpha - (1.0 - adj[:, None, :]) * 1e30                 # mask_logic
    attn = jax.nn.softmax(alpha, axis=2)                           # (B, 1, N)
    V0 = V @ p["w0t"]
    V1 = V @ p["w1t"]
    sm = s_mask[:, :, None].astype(V.dtype)
    Veff = V0 * sm + V1 * (1.0 - sm)
    attn_sum = jnp.einsum('bxn,bnh->bxh', attn, Veff)[:, 0, :] + Q @ p["writ"]
    return attn, attn_sum


if __name__ == "__main__":
    B, N, H = 16, 8, 32

    key = jax.random.PRNGKey(0)
    kq, kk, kv, ka, ks, kp = jax.random.split(key, 6)
    Q = jax.random.normal(kq, (B, H), dtype=jnp.float32)
    K = jax.random.normal(kk, (B, N, H), dtype=jnp.float32)
    V = jax.random.normal(kv, (B, N, H), dtype=jnp.float32)
    adj = (jax.random.uniform(ka, (B, N)) > 0.4).astype(jnp.float32)
    adj = adj.at[:, 0].set(1.0)                 # ensure at least one neighbour per row
    s_mask = (jax.random.uniform(ks, (B, N)) > 0.5).astype(jnp.float32)
    params = init_params(kp, H)

    ref_w, ref_sum = _reference_forward(Q, K, V, adj, s_mask, params)

    # f32 path; batch_tile=8 -> 2 grid steps, exercising the tiled/pipelined path.
    attn_w, attn_sum = gat_forward(Q, K, V, adj, s_mask, params, batch_tile=8)
    attn_w, attn_sum = jax.block_until_ready((attn_w, attn_sum))
    assert attn_w.shape == (B, 1, N)
    assert attn_sum.shape == (B, H)
    assert jnp.allclose(attn_w, ref_w, atol=1e-4, rtol=1e-4)
    assert jnp.allclose(attn_sum, ref_sum, atol=1e-4, rtol=1e-4)

    # bf16 K/V path (halves HBM traffic for the dominant inputs); auto tile size.
    attn_w16, attn_sum16 = gat_forward(Q, K, V, adj, s_mask, params,
                                       kv_dtype=jnp.bfloat16)
    attn_w16, attn_sum16 = jax.block_until_ready((attn_w16, attn_sum16))
    assert jnp.allclose(attn_w16, ref_w, atol=5e-2, rtol=5e-2)
    assert jnp.allclose(attn_sum16, ref_sum, atol=5e-2, rtol=5e-2)

    print("KERNEL_OK")
</pallas_src>

<mosaic_0001>
module attributes {stable_mosaic.version = 11 : i64} {
  func.func @_gat_kernel(%arg0: i32, %arg1: memref<8x32xf32, #tpu.memory_space<vmem>>, %arg2: memref<8x256xf32, #tpu.memory_space<vmem>>, %arg3: memref<8x256xf32, #tpu.memory_space<vmem>>, %arg4: memref<8x8xf32, #tpu.memory_space<vmem>>, %arg5: memref<8x8xf32, #tpu.memory_space<vmem>>, %arg6: memref<256x8xf32, #tpu.memory_space<vmem>>, %arg7: memref<8x256xf32, #tpu.memory_space<vmem>>, %arg8: memref<552x128xf32, #tpu.memory_space<vmem>>, %arg9: memref<8x128xf32, #tpu.memory_space<vmem>>) attributes {dimension_semantics = [#tpu.dimension_semantics<parallel>], iteration_bounds = array<i64: 2>, scalar_prefetch = 0 : i64, scratch_operands = 0 : i64, tpu.core_type = #tpu.core_type<tc>, window_params = [{transform_indices = @transform_0, window_bounds = array<i64: 8, 32>}, {transform_indices = @transform_1, window_bounds = array<i64: 8, 256>}, {transform_indices = @transform_2, window_bounds = array<i64: 8, 256>}, {transform_indices = @transform_3, window_bounds = array<i64: 8, 8>}, {transform_indices = @transform_4, window_bounds = array<i64: 8, 8>}, {pipeline_mode = #tpu.pipeline_mode<synchronous>, transform_indices = @transform_5, window_bounds = array<i64: 256, 8>}, {pipeline_mode = #tpu.pipeline_mode<synchronous>, transform_indices = @transform_6, window_bounds = array<i64: 8, 256>}, {pipeline_mode = #tpu.pipeline_mode<synchronous>, transform_indices = @transform_7, window_bounds = array<i64: 552, 128>}, {transform_indices = @transform_8, window_bounds = array<i64: 8, 128>}]} {
    %c0 = arith.constant 0 : index
    %c0_0 = arith.constant 0 : index
    %0 = vector.load %arg2[%c0, %c0_0] : memref<8x256xf32, #tpu.memory_space<vmem>>, vector<8x256xf32>
    %c0_1 = arith.constant 0 : index
    %c0_2 = arith.constant 0 : index
    %1 = vector.load %arg3[%c0_1, %c0_2] : memref<8x256xf32, #tpu.memory_space<vmem>>, vector<8x256xf32>
    %c0_3 = arith.constant 0 : index
    %c0_4 = arith.constant 0 : index
    %2 = vector.load %arg4[%c0_3, %c0_4] : memref<8x8xf32, #tpu.memory_space<vmem>>, vector<8x8xf32>
    %c0_5 = arith.constant 0 : index
    %c0_6 = arith.constant 0 : index
    %3 = vector.load %arg5[%c0_5, %c0_6] : memref<8x8xf32, #tpu.memory_space<vmem>>, vector<8x8xf32>
    %c0_7 = arith.constant 0 : index
    %c0_8 = arith.constant 0 : index
    %4 = vector.load %arg6[%c0_7, %c0_8] : memref<256x8xf32, #tpu.memory_space<vmem>>, vector<256x8xf32>
    %cst = arith.constant dense<0.000000e+00> : vector<8x8xf32>
    %5 = tpu.matmul %0, %4, %cst {dimension_numbers = #tpu.dot_dimension_numbers<[1], [0], [0], [1], [0, 0, 1, 1], [], []>} : vector<8x256xf32>, vector<256x8xf32>, vector<8x8xf32> -> vector<8x8xf32>
    %cst_9 = arith.constant 1.000000e+00 : f32
    %6 = vector.broadcast %cst_9 : f32 to vector<8x8xf32>
    %7 = arith.subf %6, %2 : vector<8x8xf32>
    %cst_10 = arith.constant 1.000000e+30 : f32
    %8 = vector.broadcast %cst_10 : f32 to vector<8x8xf32>
    %9 = arith.mulf %7, %8 : vector<8x8xf32>
    %10 = arith.subf %5, %9 : vector<8x8xf32>
    %cst_11 = arith.constant dense<0xFF800000> : vector<8xf32>
    %11 = vector.multi_reduction <maximumf>, %10, %cst_11 [1] : vector<8x8xf32> to vector<8xf32>
    %12 = vector.shape_cast %11 : vector<8xf32> to vector<8x1xf32>
    %13 = vector.broadcast %12 : vector<8x1xf32> to vector<8x8xf32>
    %14 = arith.subf %10, %13 : vector<8x8xf32>
    %15 = math.exp %14 : vector<8x8xf32>
    %cst_12 = arith.constant dense<0.000000e+00> : vector<8xf32>
    %16 = vector.multi_reduction <add>, %15, %cst_12 [1] : vector<8x8xf32> to vector<8xf32>
    %17 = vector.shape_cast %16 : vector<8xf32> to vector<8x1xf32>
    %18 = vector.broadcast %17 : vector<8x1xf32> to vector<8x8xf32>
    %19 = arith.divf %15, %18 : vector<8x8xf32>
    %c0_13 = arith.constant 0 : index
    %c0_14 = arith.constant 0 : index
    %20 = vector.load %arg7[%c0_13, %c0_14] : memref<8x256xf32, #tpu.memory_space<vmem>>, vector<8x256xf32>
    %c0_15 = arith.constant 0 : index
    %c0_16 = arith.constant 0 : index
    %21 = vector.load %arg8[%c0_15, %c0_16] : memref<552x128xf32, #tpu.memory_space<vmem>>, vector<8x128xf32>
    %cst_17 = arith.constant dense<0.000000e+00> : vector<8x128xf32>
    %22 = tpu.matmul %19, %21, %cst_17 {dimension_numbers = #tpu.dot_dimension_numbers<[1], [0], [0], [1], [0, 0, 1, 1], [], []>} : vector<8x8xf32>, vector<8x128xf32>, vector<8x128xf32> -> vector<8x128xf32>
    %23 = arith.mulf %19, %3 : vector<8x8xf32>
    %cst_18 = arith.constant dense<0.000000e+00> : vector<8x256xf32>
    %24 = tpu.matmul %23, %20, %cst_18 {dimension_numbers = #tpu.dot_dimension_numbers<[1], [0], [0], [1], [0, 0, 1, 1], [], []>} : vector<8x8xf32>, vector<8x256xf32>, vector<8x256xf32> -> vector<8x256xf32>
    %25 = arith.mulf %24, %1 : vector<8x256xf32>
    %c8 = arith.constant 8 : index
    %c0_19 = arith.constant 0 : index
    %26 = vector.load %arg8[%c8, %c0_19] : memref<552x128xf32, #tpu.memory_space<vmem>>, vector<256x128xf32>
    %cst_20 = arith.constant dense<0.000000e+00> : vector<8x128xf32>
    %27 = tpu.matmul %25, %26, %cst_20 {dimension_numbers = #tpu.dot_dimension_numbers<[1], [0], [0], [1], [0, 0, 1, 1], [], []>} : vector<8x256xf32>, vector<256x128xf32>, vector<8x128xf32> -> vector<8x128xf32>
    %28 = arith.addf %22, %27 : vector<8x128xf32>
    %29 = arith.subf %19, %23 : vector<8x8xf32>
    %cst_21 = arith.constant dense<0.000000e+00> : vector<8x256xf32>
    %30 = tpu.matmul %29, %20, %cst_21 {dimension_numbers = #tpu.dot_dimension_numbers<[1], [0], [0], [1], [0, 0, 1, 1], [], []>} : vector<8x8xf32>, vector<8x256xf32>, vector<8x256xf32> -> vector<8x256xf32>
    %31 = arith.mulf %30, %1 : vector<8x256xf32>
    %c264 = arith.constant 264 : index
    %c0_22 = arith.constant 0 : index
    %32 = vector.load %arg8[%c264, %c0_22] : memref<552x128xf32, #tpu.memory_space<vmem>>, vector<256x128xf32>
    %cst_23 = arith.constant dense<0.000000e+00> : vector<8x128xf32>
    %33 = tpu.matmul %31, %32, %cst_23 {dimension_numbers = #tpu.dot_dimension_numbers<[1], [0], [0], [1], [0, 0, 1, 1], [], []>} : vector<8x256xf32>, vector<256x128xf32>, vector<8x128xf32> -> vector<8x128xf32>
    %34 = arith.addf %28, %33 : vector<8x128xf32>
    %c0_24 = arith.constant 0 : index
    %c0_25 = arith.constant 0 : index
    %35 = vector.load %arg1[%c0_24, %c0_25] : memref<8x32xf32, #tpu.memory_space<vmem>>, vector<8x32xf32>
    %c520 = arith.constant 520 : index
    %c0_26 = arith.constant 0 : index
    %36 = vector.load %arg8[%c520, %c0_26] : memref<552x128xf32, #tpu.memory_space<vmem>>, vector<32x128xf32>
    %cst_27 = arith.constant dense<0.000000e+00> : vector<8x128xf32>
    %37 = tpu.matmul %35, %36, %cst_27 {dimension_numbers = #tpu.dot_dimension_numbers<[1], [0], [0], [1], [0, 0, 1, 1], [], []>} : vector<8x32xf32>, vector<32x128xf32>, vector<8x128xf32> -> vector<8x128xf32>
    %38 = arith.addf %34, %37 : vector<8x128xf32>
    %c0_28 = arith.constant 0 : index
    %c0_29 = arith.constant 0 : index
    %39 = vector.load %arg9[%c0_28, %c0_29] : memref<8x128xf32, #tpu.memory_space<vmem>>, vector<8x128xf32>
    tpu.vector_store %arg9[%c0_28, %c0_29], %38 {strides = array<i32>} : memref<8x128xf32, #tpu.memory_space<vmem>>, vector<8x128xf32>,
    return
  }
  func.func @transform_0(%arg0: i32) -> (i32, i32) {
    %c0_i32 = arith.constant 0 : i32
    %c0_i32_0 = arith.constant 0 : i32
    return %arg0, %c0_i32 : i32, i32
  }
  func.func @transform_1(%arg0: i32) -> (i32, i32) {
    %c0_i32 = arith.constant 0 : i32
    %c0_i32_0 = arith.constant 0 : i32
    return %arg0, %c0_i32 : i32, i32
  }
  func.func @transform_2(%arg0: i32) -> (i32, i32) {
    %c0_i32 = arith.constant 0 : i32
    %c0_i32_0 = arith.constant 0 : i32
    return %arg0, %c0_i32 : i32, i32
  }
  func.func @transform_3(%arg0: i32) -> (i32, i32) {
    %c0_i32 = arith.constant 0 : i32
    %c0_i32_0 = arith.constant 0 : i32
    return %arg0, %c0_i32 : i32, i32
  }
  func.func @transform_4(%arg0: i32) -> (i32, i32) {
    %c0_i32 = arith.constant 0 : i32
    %c0_i32_0 = arith.constant 0 : i32
    return %arg0, %c0_i32 : i32, i32
  }
  func.func @transform_5(%arg0: i32) -> (i32, i32) {
    %c0_i32 = arith.constant 0 : i32
    %c0_i32_0 = arith.constant 0 : i32
    %c0_i32_1 = arith.constant 0 : i32
    return %c0_i32, %c0_i32_0 : i32, i32
  }
  func.func @transform_6(%arg0: i32) -> (i32, i32) {
    %c0_i32 = arith.constant 0 : i32
    %c0_i32_0 = arith.constant 0 : i32
    %c0_i32_1 = arith.constant 0 : i32
    return %c0_i32, %c0_i32_0 : i32, i32
  }
  func.func @transform_7(%arg0: i32) -> (i32, i32) {
    %c0_i32 = arith.constant 0 : i32
    %c0_i32_0 = arith.constant 0 : i32
    %c0_i32_1 = arith.constant 0 : i32
    return %c0_i32, %c0_i32_0 : i32, i32
  }
  func.func @transform_8(%arg0: i32) -> (i32, i32) {
    %c0_i32 = arith.constant 0 : i32
    %c0_i32_0 = arith.constant 0 : i32
    return %arg0, %c0_i32 : i32, i32
  }
}

</mosaic_0001>

<bundles_post_ra>
// kernel: tpu_custom_call.1
= control target key start
LH: loop header
LB: loop body
LE: loop exit
PB: predicated region body
PF: predicated region fallthrough
CT: control target
= control target key end

     0   :  { %13 = vsyncpa [#allocation3], 0  ;;  %s1790_s0 = inlined_call_operand.vmem [shape: f32[16,32], index: 0, kind: input, shape index: {}]   ;;  %s1791_s1 = inlined_call_operand.vmem [shape: f32[16,256], index: 1, kind: input, shape index: {}]   ;;  %s1792_s2 = inlined_call_operand.vmem [shape: f32[16,256], index: 2, kind: input, shape index: {}]   ;;  %s1793_s3 = inlined_call_operand.vmem [shape: f32[16,8], index: 3, kind: input, shape index: {}]   ;;  %s1794_s4 = inlined_call_operand.vmem [shape: f32[16,8], index: 4, kind: input, shape index: {}]   ;;  %s1795_s5 = inlined_call_operand.vmem [shape: f32[256,8], index: 5, kind: input, shape index: {}]   ;;  %s1796_s6 = inlined_call_operand.vmem [shape: f32[8,256], index: 6, kind: input, shape index: {}]   ;;  %s1797_s7 = inlined_call_operand.hbm [shape: f32[552,128], index: 7, kind: input, shape index: {}]   ;;  %s1798_s8 = inlined_call_operand.hbm [shape: f32[16,128], index: 8, kind: output, shape index: {}]  }
   0x1   :  { %14 = vsyncpa [#allocation4], 0 }
   0x2   :  { %16 = vsyncpa [#allocation4 + $0x1], 0  ;;  %s1515_s27 = smov 0   ;;  %s1517_s28 = smov 0  }
   0x3   :  { %s1519_s29 = smov 0   ;;  %s1521_s30 = smov 0  }
   0x4 LB: > { %s1536_s9 = sadd.s32 4294967295, %s1462_s30   ;;  %s1162_s10 = sadd.s32 4294967294, %s1462_s30   ;;  %s1462_s30 = sphi %s1521_s30, %s1806_s30   ;;  %s1458_s29 = sphi %s1519_s29, %s1805_s29   ;;  %s1454_s28 = sphi %s1517_s28, %s1804_s28   ;;  %s1450_s27 = sphi %s1515_s27, %s1803_s27  }
   0x5   : > { %s1540_s11 = sadd.s32 1, %s1462_s30   ;;  %s222_s12 = sadd.s32 1, %s1458_s29 }
   0x6   : > { %s219_s13 = ssub.s32 %s1462_s30, %s1540_s11  ;;  %p232_p0 = scmp.ne.s32.totalorder %s1458_s29, %s1454_s28 }
   0x7   : > { %p220_p1 = scmp.eq.s32.totalorder %s219_s13, 0  ;;  %p233_p2 = scmp.eq.s32.totalorder %s1536_s9, 1 }
   0x8   : > { %p238_p3 = scmp.ne.s32.totalorder %s1454_s28, %s1450_s27  ;;  %p239_p4 = scmp.eq.s32.totalorder %s1162_s10, 1 }
   0x9   : > { %s1551_s14 = scalar_select %p220_p1, %s1458_s29, %s222_s12  }
   0xa   : > { %p1553_p5 = por %p233_p2, %p232_p0  ;;  %p1557_p6 = por %p239_p4, %p238_p3 }
   0xb   : > { %p1163_p7 = scmp.ge.s32.totalorder %s1462_s30, 1  ;;  %p246_p8 = scmp.lt.s32.totalorder %s1462_s30, 3 }
   0xc   : > { %s1800_s16 = scalar_select %p1557_p6, 1, 0 }
   0xd   : > { %p1328_p9 = scmp.eq.s32.totalorder %s1536_s9, 0  ;;  %p1564_p10 = pnand %p1163_p7, %p246_p8 }
   0xe   : > { %s1464_s18 = smov [#allocation2]  }
   0xf   : > { %s264_s19 = sshll.u32 %s1464_s18, 4  ;;  %p1320_p11 = pneg %p1564_p10  ;;  %s265_s19 = int_to_ptr.vmem [resolvable:$true] %s264_s19 }
  0x10   : > { %s1383_s20 = scalar_lea.vmem %s265_s19, 8832  ;;  %p1391_p3 = scmp.lt.s32.totalorder %s265_s19, %s265_s19 }
  0x11   : > { %p1321_p12 = pnand %p1328_p9, %p1320_p11  ;;  %p1384_p0 = scmp.ne.s32.totalorder %s265_s19, %s1383_s20 }
  0x12   : > { %p1392_p4 = scmp.lt.s32.totalorder %s1383_s20, %s1383_s20 }
  0x13   : > { %p1374_p13 = pneg %p1321_p12 }
  0x14   : > { %p1393_p6 = por %p1392_p4, %p1391_p3 }
  0x15   : > { %p1386_p1 = pnand %p1384_p0, %p1374_p13 }
  0x17   : > { %p1387_p2 = pneg %p1386_p1 }
  0x19   : > { %p1394_p7 = pnand %p1393_p6, %p1387_p2 }
  0x1b   : > { %1397 = shalt.err (!%p1394_p7)
}
  0x1c   : > { %s1465_s21 = smov 128   ;;  %s1466_s22 = smov 8  }
  0x1d   : > { %1323 = dma.hbm_to_vmem [thread:$0]  (!%p1321_p12), %s1797_s7, 8832, %s265_s19, [#allocation3], %s1465_s21, %s1465_s21, %s1466_s22  }
  0x1e   : > { %317 = sbr.rel (%p1564_p10) target bundleno = 1200 (0x4b0), region = 52 }
  0x23   : > { %1441 = dma.done.wait (%p1328_p9), [#allocation3], 8832  }
  0x24   : > { %1443 = vsyncadd (%p1328_p9), [#allocation3], 4294958464  ;;  %p368_p8 = scmp.lt.s32.totalorder %s1536_s9, 1  ;;  %v427_v0 = vld [vmem:[%s1795_s5 + $0xf8] sm:$0xff]  ;;  %v426_v2 = vld [vmem:[%s1795_s5 + $0xf0] sm:$0xff]  ;;  %vm501_vm0 = vcmask 64512  }
  0x25   : > { %v411_v1 = vld [vmem:[%s1795_s5 + $0x78] sm:$0xff]  ;;  %1186 = vmatprep.subr.mxu0 %v427_v0  ;;  %v410_v3 = vld [vmem:[%s1795_s5 + $0x70] sm:$0xff]  ;;  %v425_v4 = vld [vmem:[%s1795_s5 + $0xe8] sm:$0xff]  ;;  %v1467_v49 = vmov 0.0   ;;  %vm1468_vm1 = vmmov 0   ;;  %vm953_vm2 = vcmask 261120  }
  0x26   : > { %s1592_s18 = scalar_select %p368_p8, %s1536_s9, 1  ;;  %1187 = vmatpush3.msra.mxu0 %v411_v1  ;;  %v409_v5 = vld [vmem:[%s1795_s5 + $0x68] sm:$0xff]  ;;  %v424_v6 = vld [vmem:[%s1795_s5 + $0xe0] sm:$0xff]  ;;  %v423_v8 = vld [vmem:[%s1795_s5 + $0xd8] sm:$0xff]  ;;  %584 = vmatprep.mubr.f32.mxu1 %v1467_v49 }
  0x27   : > { %1188 = vmatprep.subr.mxu0 %v426_v2  ;;  %v408_v7 = vld [vmem:[%s1795_s5 + $0x60] sm:$0xff]  ;;  %v407_v9 = vld [vmem:[%s1795_s5 + $0x58] sm:$0xff]  ;;  %v422_v10 = vld [vmem:[%s1795_s5 + $0xd0] sm:$0xff]  ;;  %s1181_s23 = sshll.u32 %s1536_s9, 7 }
  0x28   : > { %1189 = vmatpush3.msra.mxu0 %v410_v3  ;;  %s1184_s10 = sshll.u32 %s1592_s18, 4  ;;  %v406_v11 = vld [vmem:[%s1795_s5 + $0x50] sm:$0xff]  ;;  %v421_v12 = vld [vmem:[%s1795_s5 + $0xc8] sm:$0xff]  ;;  %v420_v15 = vld [vmem:[%s1795_s5 + $0xc0] sm:$0xff]  ;;  %s1692_s17 = sshll.u32 %s1592_s18, 3 }
  0x29   : > { %1190 = vmatprep.subr.mxu0 %v425_v4  ;;  %s1621_s24 = scalar_lea.vmem %s1791_s1, %s1184_s10  ;;  %v405_v14 = vld [vmem:[%s1795_s5 + $0x48] sm:$0xff]  ;;  %v404_v16 = vld [vmem:[%s1795_s5 + $0x40] sm:$0xff]  ;;  %v419_v17 = vld [vmem:[%s1795_s5 + $0xb8] sm:$0xff]  ;;  %s385_s21 = scalar_lea.vmem %s1793_s3, %s1692_s17 }
  0x2a   : > { %1191 = vmatpush3.msra.mxu0 %v409_v5  ;;  %v391_v13 = vld [vmem:[%s1621_s24 + $0x8] sm:$0xff]  ;;  %v403_v18 = vld [vmem:[%s1795_s5 + $0x38] sm:$0xff]  ;;  %v418_v19 = vld [vmem:[%s1795_s5 + $0xb0] sm:$0xff]  ;;  %s389_s13 = scalar_lea.vmem %s1794_s4, %s1692_s17  ;;  %s1041_s19 = scalar_lea.hbm %s1798_s8, %s1181_s23 }
  0x2b   : > { %1192 = vmatprep.subr.mxu0 %v424_v6  ;;  %492 = vmatprep.mubr.f32.mxu0 %v391_v13  ;;  %v402_v20 = vld [vmem:[%s1795_s5 + $0x30] sm:$0xff]  ;;  %v417_v21 = vld [vmem:[%s1795_s5 + $0xa8] sm:$0xff]  ;;  %v416_v23 = vld [vmem:[%s1795_s5 + $0xa0] sm:$0xff]  ;;  %s1469_s18 = smov [#allocation5]  }
  0x2c   : > { %1193 = vmatpush3.msra.mxu0 %v408_v7  ;;  %v401_v22 = vld [vmem:[%s1795_s5 + $0x28] sm:$0xff]  ;;  %v400_v24 = vld [vmem:[%s1795_s5 + $0x20] sm:$0xff]  ;;  %v415_v25 = vld [vmem:[%s1795_s5 + $0x98] sm:$0xff] }
  0x2d   : > { %1194 = vmatprep.subr.mxu0 %v423_v8  ;;  %v399_v26 = vld [vmem:[%s1795_s5 + $0x18] sm:$0xff]  ;;  %v414_v27 = vld [vmem:[%s1795_s5 + $0x90] sm:$0xff]  ;;  %v413_v29 = vld [vmem:[%s1795_s5 + $0x88] sm:$0xff] }
  0x2e   : > { %1195 = vmatpush3.msra.mxu0 %v407_v9  ;;  %v398_v28 = vld [vmem:[%s1795_s5 + $0x10] sm:$0xff]  ;;  %v397_v30 = vld [vmem:[%s1795_s5 + $0x8] sm:$0xff]  ;;  %v412_v31 = vld [vmem:[%s1795_s5 + $0x80] sm:$0xff] }
  0x2f   : > { %1196 = vmatprep.subr.mxu0 %v422_v10  ;;  %v396_v32 = vld [vmem:[%s1795_s5] sm:$0xff]  ;;  %v1703_v47 = vld [vmem:[%s1796_s6 + $0x8] sm:$0xff]  ;;  %v623_v57 = vld [vmem:[#allocation2 + $0xf8] sm:$0xff] }
  0x30   : > { %1197 = vmatpush3.msra.mxu0 %v406_v11  ;;  %v390_v33 = vld [vmem:[%s1621_s24] sm:$0xff]  ;;  %550 = vmatprep.subr.mxu1 %v1703_v47  ;;  %v607_v58 = vld [vmem:[#allocation2 + $0x78] sm:$0xff]  ;;  %v622_v59 = vld [vmem:[#allocation2 + $0xf0] sm:$0xff]  ;;  %s371_s24 = scalar_lea.vmem %s1790_s0, %s1692_s17  ;;  %s365_s17 = sand.u32 1, %s1454_s28  }
  0x31   : > { %1198 = vmatprep.subr.mxu0 %v421_v12  ;;  %v394_v34 = vld [vmem:[%s385_s21] sm:$0xff]  ;;  %v606_v60 = vld [vmem:[#allocation2 + $0x70] sm:$0xff]  ;;  %v621_v61 = vld [vmem:[#allocation2 + $0xe8] sm:$0xff]  ;;  %s381_s21 = scalar_lea.vmem %s1792_s2, %s1184_s10  ;;  %s1168_s22 = sshll.u32 %s365_s17, 3 }
  0x32   : > { %1199 = vmatpush3.msra.mxu0 %v405_v14  ;;  %v498_v35 = vsub.f32 1.0, %v394_v34  ;;  %v1708_v48 = vld [vmem:[%s1796_s6] sm:$0xff]  ;;  %v605_v62 = vld [vmem:[#allocation2 + $0x68] sm:$0xff]  ;;  %v619_v1 = vld [vmem:[#allocation2 + $0xd8] sm:$0xff]  ;;  %s367_s25 = scalar_lea.vmem [#allocation5], %s1168_s22  ;;  %s1030_s20 = scalar_lea.sflag [#allocation4], %s365_s17 }
  0x33   : > { %1200 = vmatprep.subr.mxu0 %v420_v15  ;;  %551 = vmatpush1.msra.mxu1 %v1708_v48  ;;  %v624_v50 = vld [vmem:[#allocation2 + $0x100] sm:$0xff]  ;;  %v603_v2 = vld [vmem:[#allocation2 + $0x58] sm:$0xff]  ;;  %v618_v3 = vld [vmem:[#allocation2 + $0xd0] sm:$0xff]  ;;  %s1043_s26 = sshll.u32 %s367_s25, 4  ;;  %s1402_s10 = sshll.u32 %s1469_s18, 4  ;;  %s1044_s26 = int_to_ptr.vmem [resolvable:$true] %s1043_s26  ;;  %s1403_s10 = int_to_ptr.vmem [resolvable:$false] %s1402_s10 }
  0x34   : > { %1201 = vmatpush3.msra.mxu0 %v404_v16  ;;  %v499_v37 = vmul.f32 1e+30, %v498_v35  ;;  %1221 = vmatprep.subr.mxu1 %v624_v50  ;;  %v395_v53 = vld [vmem:[%s389_s13] sm:$0xff]  ;;  %v602_v4 = vld [vmem:[#allocation2 + $0x50] sm:$0xff]  ;;  %v617_v5 = vld [vmem:[#allocation2 + $0xc8] sm:$0xff]  ;;  %s1404_s9 = scalar_lea.vmem %s1403_s10, 256  ;;  %p1405_p11 = scmp.lt.s32.totalorder %s1044_s26, %s1403_s10 }
  0x35   : > { %1202 = vmatprep.subr.mxu0 %v419_v17  ;;  %v608_v56 = vld [vmem:[#allocation2 + $0x80] sm:$0xff]  ;;  %v601_v6 = vld [vmem:[#allocation2 + $0x48] sm:$0xff]  ;;  %v615_v9 = vld [vmem:[#allocation2 + $0xb8] sm:$0xff] }
  0x36   : > { %1203 = vmatpush3.msra.mxu0 %v403_v18  ;;  %v620_v63 = vld [vmem:[#allocation2 + $0xe0] sm:$0xff]  ;;  %v599_v10 = vld [vmem:[#allocation2 + $0x38] sm:$0xff]  ;;  %v614_v11 = vld [vmem:[#allocation2 + $0xb0] sm:$0xff] }
  0x37   : > { %1204 = vmatprep.subr.mxu0 %v418_v19  ;;  %v604_v0 = vld [vmem:[#allocation2 + $0x60] sm:$0xff]  ;;  %v598_v12 = vld [vmem:[#allocation2 + $0x30] sm:$0xff]  ;;  %v613_v13 = vld [vmem:[#allocation2 + $0xa8] sm:$0xff] }
  0x38   : > { %1205 = vmatpush3.msra.mxu0 %v402_v20  ;;  %v616_v7 = vld [vmem:[#allocation2 + $0xc0] sm:$0xff]  ;;  %v597_v14 = vld [vmem:[#allocation2 + $0x28] sm:$0xff]  ;;  %v611_v17 = vld [vmem:[#allocation2 + $0x98] sm:$0xff] }
  0x39   : > { %1206 = vmatprep.subr.mxu0 %v417_v21  ;;  %v600_v8 = vld [vmem:[#allocation2 + $0x40] sm:$0xff]  ;;  %v595_v18 = vld [vmem:[#allocation2 + $0x18] sm:$0xff]  ;;  %v610_v19 = vld [vmem:[#allocation2 + $0x90] sm:$0xff] }
  0x3a   : > { %1207 = vmatpush3.msra.mxu0 %v401_v22  ;;  %v612_v15 = vld [vmem:[#allocation2 + $0xa0] sm:$0xff]  ;;  %v594_v20 = vld [vmem:[#allocation2 + $0x10] sm:$0xff]  ;;  %v609_v21 = vld [vmem:[#allocation2 + $0x88] sm:$0xff] }
  0x3b   : > { %1208 = vmatprep.subr.mxu0 %v416_v23  ;;  %v596_v16 = vld [vmem:[#allocation2 + $0x20] sm:$0xff]  ;;  %v593_v22 = vld [vmem:[#allocation2 + $0x8] sm:$0xff]  ;;  %v855_v34 = vld [vmem:[#allocation2 + $0x158] sm:$0xff] }
  0x3c   : > { %1209 = vmatpush3.msra.mxu0 %v400_v24  ;;  %v876_v23 = vld [vmem:[#allocation2 + $0x200] sm:$0xff]  ;;  %v870_v35 = vld [vmem:[#allocation2 + $0x1d0] sm:$0xff] }
  0x3d   : > { %1210 = vmatprep.subr.mxu0 %v415_v25  ;;  %v860_v24 = vld [vmem:[#allocation2 + $0x180] sm:$0xff]  ;;  %v875_v25 = vld [vmem:[#allocation2 + $0x1f8] sm:$0xff] }
  0x3e   : > { %1211 = vmatpush3.msra.mxu0 %v399_v26  ;;  %v859_v26 = vld [vmem:[#allocation2 + $0x178] sm:$0xff]  ;;  %v515_v50 = vld [vmem:[#allocation2] sm:$0xff] }
  0x3f   : > { %1212 = vmatprep.subr.mxu0 %v414_v27  ;;  %v874_v27 = vld [vmem:[#allocation2 + $0x1f0] sm:$0xff] }
  0x40   : > { %1213 = vmatpush3.msra.mxu0 %v398_v28  ;;  %v858_v28 = vld [vmem:[#allocation2 + $0x170] sm:$0xff] }
  0x41   : > { %1214 = vmatprep.subr.mxu0 %v413_v29  ;;  %v873_v29 = vld [vmem:[#allocation2 + $0x1e8] sm:$0xff] }
  0x42   : > { %1215 = vmatpush3.msra.mxu0 %v397_v30  ;;  %v857_v30 = vld [vmem:[#allocation2 + $0x168] sm:$0xff] }
  0x43   : > { %1216 = vmatprep.subr.mxu0 %v412_v31  ;;  %v872_v31 = vld [vmem:[#allocation2 + $0x1e0] sm:$0xff] }
  0x44   : > { %1217 = vmatpush3.msra.mxu0 %v396_v32  ;;  %v856_v32 = vld [vmem:[#allocation2 + $0x160] sm:$0xff] }
  0x45   : > { %493 = vmatmul.mubr.f32.vlgmr.msra.gmra.mxu0 %v390_v33  ;;  %1258 = vmatprep.subr.mxu0 %v876_v23  ;;  %v871_v33 = vld [vmem:[#allocation2 + $0x1d8] sm:$0xff] }
  0x46   : > { %1259 = vmatpush3.msra.mxu0 %v860_v24 }
  0x47   : > { %1260 = vmatprep.subr.mxu0 %v875_v25 }
  0x48   : > { %1261 = vmatpush3.msra.mxu0 %v859_v26 }
  0x49   : > { %1262 = vmatprep.subr.mxu0 %v874_v27 }
  0x4a   : > { %1263 = vmatpush3.msra.mxu0 %v858_v28 }
  0x4b   : > { %1264 = vmatprep.subr.mxu0 %v873_v29 }
  0x4c   : > { %1265 = vmatpush3.msra.mxu0 %v857_v30 }
  0x4d   : > { %1266 = vmatprep.subr.mxu0 %v872_v31 }
  0x4e   : > { %1267 = vmatpush3.msra.mxu0 %v856_v32 }
  0x4f   : > { %1268 = vmatprep.subr.mxu0 %v871_v33 }
  0x50   : > { %1269 = vmatpush3.msra.mxu0 %v855_v34 }
  0x51   : > { %1270 = vmatprep.subr.mxu0 %v870_v35 }
 0x105   : > { %v1218_v36 = vpop.f32.mrf.mxu0 }
 0x107   : > { %v1219_v38 = vpop.f32.mrf.mxu0 }
 0x108   : > { %v1220_v39 = vadd.f32 %v1219_v38, %v1218_v36  ;;  %v854_v36 = vld [vmem:[#allocation2 + $0x150] sm:$0xff]  ;;  %v853_v38 = vld [vmem:[#allocation2 + $0x148] sm:$0xff] }
 0x109   : > { %1271 = vmatpush3.msra.mxu0 %v854_v36 }
 0x10a   : > { %v500_v40 = vsub.f32 %v1220_v39, %v499_v37  ;;  %v869_v37 = vld [vmem:[#allocation2 + $0x1c8] sm:$0xff]  ;;  %v868_v39 = vld [vmem:[#allocation2 + $0x1c0] sm:$0xff] }
 0x10b   : > { %1272 = vmatprep.subr.mxu0 %v869_v37 }
 0x10c   : > { %v502_v41 = vsel %vm501_vm0, %v500_v40, -inf  ;;  %1273 = vmatpush3.msra.mxu0 %v853_v38 }
 0x10d   : > { %503 = vmax.xlane.f32.xlu0 %v502_v41  ;;  %1274 = vmatprep.subr.mxu0 %v868_v39 }
 0x196   : > { %v504_v42 = vpop.xlane.xlu0 %503 }
 0x197   : > { %v505_v43 = vsub.f32 %v500_v40, %v504_v42  ;;  %v852_v40 = vld [vmem:[#allocation2 + $0x140] sm:$0xff]  ;;  %v1730_v42 = vld [vmem:[%s381_s21 + $0x8] sm:$0xff] }
 0x198   : > { %1275 = vmatpush3.msra.mxu0 %v852_v40 }
 0x199   : > { %v506_v44 = vmul.f32 1.442695, %v505_v43  ;;  %v1732_v43 = vld [vmem:[%s381_s21] sm:$0xff]  ;;  %s1398_s21 = scalar_lea.vmem %s1044_s26, 128 }
 0x19a   : > { %p1399_p6 = scmp.ne.s32.totalorder %s1044_s26, %s1398_s21  ;;  %p1406_p12 = scmp.lt.s32.totalorder %s1404_s9, %s1398_s21 }
 0x19b   : > { %1368 = vpow2.f32 %v506_v44 }
 0x19c   : > { %p1400_p9 = pnand %p1399_p6, %p1553_p5  ;;  %p1407_p13 = por %p1406_p12, %p1405_p11 }
 0x19e   : > { %p1401_p10 = pneg %p1400_p9 }
 0x1a0   : > { %p1408_p0 = pnand %p1407_p13, %p1401_p10 }
 0x1a8   : > { %v1369_v45 = vpop.eup %1368 }
 0x1a9   : > { %v508_v46 = vsel %vm501_vm0, %v1369_v45, 0.0 }
 0x1aa   : > { %509 = vadd.xlane.f32.xlu0 %v508_v46 }
 0x233   : > { %v510_v51 = vpop.xlane.xlu0 %509 }
 0x234   : > { %1370 = vrcp.f32 %v510_v51 }
 0x241   : > { %v1371_v52 = vpop.eup %1370 }
 0x242   : > { %v1717_v54 = vmul.f32 %v1371_v52, %v1369_v45  ;;  %v867_v52 = vld [vmem:[#allocation2 + $0x1b8] sm:$0xff] }
 0x243   : > { %1276 = vmatprep.subr.mxu0 %v867_v52 }
 0x244   : > { %v1720_v55 = vmul.f32 %v1717_v54, %v395_v53  ;;  %v851_v53 = vld [vmem:[#allocation2 + $0x138] sm:$0xff] }
 0x245   : > { %1277 = vmatpush3.msra.mxu0 %v851_v53 }
 0x246   : > { %1176 = vmatmul.mubr.msk.f32.vlgmr.msra.gmra.mxu1 %vm501_vm0, %v1720_v55  ;;  %v768_v51 = vsub.f32 %v1717_v54, %v1720_v55  ;;  %v863_v55 = vld [vmem:[#allocation2 + $0x198] sm:$0xff] }
 0x247   : > { %1222 = vmatpush3.msra.mxu1 %v608_v56  ;;  %v850_v56 = vld [vmem:[#allocation2 + $0x130] sm:$0xff] }
 0x248   : > { %1223 = vmatprep.subr.mxu1 %v623_v57  ;;  %v849_v57 = vld [vmem:[#allocation2 + $0x128] sm:$0xff] }
 0x249   : > { %1224 = vmatpush3.msra.mxu1 %v607_v58  ;;  %v864_v58 = vld [vmem:[#allocation2 + $0x1a0] sm:$0xff] }
 0x24a   : > { %1225 = vmatprep.subr.mxu1 %v622_v59  ;;  %v847_v59 = vld [vmem:[#allocation2 + $0x118] sm:$0xff] }
 0x24b   : > { %1226 = vmatpush3.msra.mxu1 %v606_v60  ;;  %v862_v60 = vld [vmem:[#allocation2 + $0x190] sm:$0xff] }
 0x24c   : > { %1227 = vmatprep.subr.mxu1 %v621_v61  ;;  %v846_v61 = vld [vmem:[#allocation2 + $0x110] sm:$0xff] }
 0x24d   : > { %1228 = vmatpush3.msra.mxu1 %v605_v62  ;;  %v952_v62 = vld [vmem:[#allocation2 + $0x220] sm:$0xff] }
 0x24e   : > { %1229 = vmatprep.subr.mxu1 %v620_v63  ;;  %v861_v63 = vld [vmem:[#allocation2 + $0x188] sm:$0xff] }
 0x24f   : > { %1230 = vmatpush3.msra.mxu1 %v604_v0  ;;  %v845_v0 = vld [vmem:[#allocation2 + $0x108] sm:$0xff] }
 0x250   : > { %1231 = vmatprep.subr.mxu1 %v619_v1  ;;  %v951_v1 = vld [vmem:[#allocation2 + $0x218] sm:$0xff] }
 0x251   : > { %1232 = vmatpush3.msra.mxu1 %v603_v2  ;;  %v950_v2 = vld [vmem:[#allocation2 + $0x210] sm:$0xff] }
 0x252   : > { %1233 = vmatprep.subr.mxu1 %v618_v3  ;;  %v949_v3 = vld [vmem:[#allocation2 + $0x208] sm:$0xff] }
 0x253   : > { %1234 = vmatpush3.msra.mxu1 %v602_v4  ;;  %v948_v4 = vld [vmem:[%s371_s24] sm:$0xff] }
 0x254   : > { %1235 = vmatprep.subr.mxu1 %v617_v5 }
 0x255   : > { %1236 = vmatpush3.msra.mxu1 %v601_v6 }
 0x256   : > { %1237 = vmatprep.subr.mxu1 %v616_v7 }
 0x257   : > { %1238 = vmatpush3.msra.mxu1 %v600_v8 }
 0x258   : > { %1239 = vmatprep.subr.mxu1 %v615_v9 }
 0x259   : > { %1240 = vmatpush3.msra.mxu1 %v599_v10 }
 0x25a   : > { %1241 = vmatprep.subr.mxu1 %v614_v11 }
 0x25b   : > { %1242 = vmatpush3.msra.mxu1 %v598_v12 }
 0x25c   : > { %1243 = vmatprep.subr.mxu1 %v613_v13 }
 0x25d   : > { %1244 = vmatpush3.msra.mxu1 %v597_v14 }
 0x25e   : > { %1245 = vmatprep.subr.mxu1 %v612_v15 }
 0x25f   : > { %1246 = vmatpush3.msra.mxu1 %v596_v16 }
 0x260   : > { %1247 = vmatprep.subr.mxu1 %v611_v17 }
 0x261   : > { %1248 = vmatpush3.msra.mxu1 %v595_v18 }
 0x262   : > { %1249 = vmatprep.subr.mxu1 %v610_v19 }
 0x263   : > { %1250 = vmatpush3.msra.mxu1 %v594_v20 }
 0x264   : > { %1251 = vmatprep.subr.mxu1 %v609_v21 }
 0x265   : > { %1252 = vmatpush3.msra.mxu1 %v593_v22 }
 0x266   : > { %1298 = vmatprep.subr.mxu1 %v1467_v49 }
 0x306   : > { %v586_v41 = vpop.f32.mrf.mxu1 }
 0x307   : > { %v591_v46 = vmul.f32 %v586_v41, %v1732_v43 }
 0x308   : > { %v588_v44 = vpop.f32.mrf.mxu1 }
 0x309   : > { %v592_v45 = vmul.f32 %v588_v44, %v1730_v42 }
 0x30b   : > { %689 = vmatprep.mubr.f32.mxu1 %v592_v45 }
 0x30c   : > { %690 = vmatmul.mubr.f32.vlgmr.msra.gmra.mxu1 %v591_v46 }
 0x30d   : > { %1299 = vmatpush3.msra.mxu1 %v515_v50  ;;  %1300 = vmatprep.mubr.msk.f32.mxu1 %vm1468_vm1, %v1467_v49 }
 0x30e   : > { %802 = vmatprep.subr.mxu1 %v1703_v47  ;;  %v866_v47 = vld [vmem:[#allocation2 + $0x1b0] sm:$0xff] }
 0x30f   : > { %1278 = vmatprep.subr.mxu0 %v866_v47 }
 0x310   : > { %1301 = vmatmul.mubr.msk.f32.vlgmr.msra.gmra.mxu1 %vm501_vm0, %v1717_v54  ;;  %1279 = vmatpush3.msra.mxu0 %v850_v56  ;;  %v848_v54 = vld [vmem:[#allocation2 + $0x120] sm:$0xff] }
 0x311   : > { %803 = vmatpush1.msra.mxu1 %v1708_v48  ;;  %836 = vmatprep.mubr.f32.mxu1 %v1467_v49  ;;  %v865_v48 = vld [vmem:[#allocation2 + $0x1a8] sm:$0xff] }
 0x312   : > { %1303 = vmatprep.subr.mxu1 %v1467_v49  ;;  %1280 = vmatprep.subr.mxu0 %v865_v48 }
 0x313   : > { %1281 = vmatpush3.msra.mxu0 %v849_v57 }
 0x314   : > { %1178 = vmatmul.mubr.msk.f32.vlgmr.msra.gmra.mxu1 %vm501_vm0, %v768_v51  ;;  %1282 = vmatprep.subr.mxu0 %v864_v58 }
 0x315   : > { %1311 = vmatprep.mubr.msk.f32.mxu1 %vm1468_vm1, %v1467_v49  ;;  %1283 = vmatpush3.msra.mxu0 %v848_v54 }
 0x316   : > { %1284 = vmatprep.subr.mxu0 %v863_v55  ;;  %1304 = vmatpush3.msra.mxu1 %v952_v62 }
 0x317   : > { %1285 = vmatpush3.msra.mxu0 %v847_v59  ;;  %1305 = vmatprep.subr.mxu1 %v1467_v49 }
 0x318   : > { %1286 = vmatprep.subr.mxu0 %v862_v60  ;;  %1306 = vmatpush3.msra.mxu1 %v951_v1 }
 0x319   : > { %1287 = vmatpush3.msra.mxu0 %v846_v61  ;;  %1307 = vmatprep.subr.mxu1 %v1467_v49 }
 0x31a   : > { %1288 = vmatprep.subr.mxu0 %v861_v63  ;;  %1308 = vmatpush3.msra.mxu1 %v950_v2 }
 0x31b   : > { %1289 = vmatpush3.msra.mxu0 %v845_v0  ;;  %1309 = vmatprep.subr.mxu1 %v1467_v49 }
 0x31c   : > { %1310 = vmatpush3.msra.mxu1 %v949_v3 }
 0x31d   : > { %1312 = vmatmul.mubr.msk.f32.vlgmr.msra.gmra.mxu1 %vm953_vm2, %v948_v4 }
 0x3cc   : > { %v1253_v5 = vpop.f32.mrf.mxu1 }
 0x3ce   : > { %v1254_v6 = vpop.f32.mrf.mxu1 }
 0x3cf   : > { %v1255_v7 = vadd.f32 %v1254_v6, %v1253_v5 }
 0x3d0   : > { %v764_v8 = vpop.f32.mrf.mxu1 }
 0x3d1   : > { %v765_v9 = vadd.f32 %v1255_v7, %v764_v8 }
 0x3d2   : > { %v1302_v10 = vpop.f32.mrf.mxu1 }
 0x3d4   : > { %v838_v11 = vpop.f32.mrf.mxu1 }
 0x3d5   : > { %v843_v14 = vmul.f32 %v838_v11, %v1732_v43 }
 0x3d6   : > { %v840_v12 = vpop.f32.mrf.mxu1 }
 0x3d7   : > { %v844_v13 = vmul.f32 %v840_v12, %v1730_v42 }
 0x3d9   : > { %941 = vmatprep.mubr.f32.mxu0 %v844_v13 }
 0x3da   : > { %942 = vmatmul.mubr.f32.vlgmr.msra.gmra.mxu0 %v843_v14 }
 0x3dd   : > { %v1023_v15 = vpop.f32.mrf.mxu1 }
 0x3df   : > { %v1313_v49 = vpop.f32.mrf.mxu1 }
 0x49a   : > { %v1290_v16 = vpop.f32.mrf.mxu0 }
 0x49c   : > { %v1291_v17 = vpop.f32.mrf.mxu0 }
 0x49d   : > { %v1292_v18 = vadd.f32 %v1291_v17, %v1290_v16 }
 0x49f   : > { %v947_v19 = vadd.f32 %v1292_v18, %v765_v9 }
 0x4a1   : > { %v1027_v20 = vadd.f32 %v1023_v15, %v947_v19 }
 0x4a3   : > { %1028 = vst [vmem:[%s367_s25] sm:$0xff] %v1027_v20 }
 0x4a4   : > { %1411 = shalt.err (!%p1408_p0)
}
 0x4a5   : > { %s1412_s24 = scalar_lea.hbm %s1041_s19, 128  ;;  %s1416_s23 = scalar_lea.hbm %s1798_s8, 256 }
 0x4a6   : > { %p1413_p1 = scmp.ne.s32.totalorder %s1041_s19, %s1412_s24  ;;  %p1417_p4 = scmp.lt.s32.totalorder %s1041_s19, %s1798_s8 }
 0x4a7   : > { %p1418_p7 = scmp.lt.s32.totalorder %s1416_s23, %s1412_s24 }
 0x4a8   : > { %p1414_p2 = pnand %p1413_p1, %p1553_p5 }
 0x4a9   : > { %p1419_p8 = por %p1418_p7, %p1417_p4 }
 0x4aa   : > { %p1415_p3 = pneg %p1414_p2 }
 0x4ac   : > { %p1420_p6 = pnand %p1419_p8, %p1415_p3 }
 0x4ae   : > { %1423 = shalt.err (!%p1420_p6)
}
 0x4af   : > { %1318 = dma.vmem_to_hbm [thread:$0]  (%p1553_p5), %s1044_s26, 128, %s1041_s19, %s1030_s20  }
 0x4b0 PF: > { %p1330_p9 = scmp.ge.s32.totalorder %s1462_s30, 2  ;;  %s1055_s13 = sand.u32 1, %s1450_s27  }
 0x4b1   : > { %p1802_p10 = scmp.ne.s32.totalorder %s1800_s16, 0  ;;  %s1056_s21 = scalar_lea.sflag [#allocation4], %s1055_s13 }
 0x4b3   : > { %p1325_p11 = pnand %p1330_p9, %p1802_p10 }
 0x4b5   : > { %p1326_p12 = pneg %p1325_p11 }
 0x4b7   : > { %1445 = dma.done.wait (%p1326_p12), %s1056_s21, 128  }
 0x4b8   : > { %1447 = vsyncadd (%p1326_p12), %s1056_s21, 4294967168  ;;  %p19_p13 = scmp.ge.s32.totalorder %s1540_s11, 4   ;;  %s1803_s27 = smov %s1454_s28 }
 0x4b9   : > { %s1804_s28 = smov %s1458_s29  ;;  %s1805_s29 = smov %s1551_s14 }
 0x4ba   : > { %s1806_s30 = smov %s1540_s11  ;;  %21 = sbr.rel (!%p19_p13) target bundleno = 4 (0x4), region = 104 }
 0x4bf   :  { %1061 = vsyncpa [#allocation3], 1 }
 0x4c0   :  { %1063 = vsyncpa [#allocation3 + $0x1], 1 }
 0x4c1   :  { %1064 = vsyncpa [#allocation4], 1 }
 0x4c2   :  { %1066 = vsyncpa [#allocation4 + $0x1], 1 }

</bundles_post_ra>
